<compile_context>
chip_gen: v5e
topology: v5e:2x2
jax: 0.10.0
libtpu: 0.0.40
codegen_flags: <defaults>
</compile_context>

<pallas_src>
import functools

import jax
import jax.numpy as jnp
from jax.experimental import pallas as pl
from jax.experimental.pallas import tpu as pltpu


def _pick_batch_tile(B, N, target_rows=512):
    """How many batch elements to process per grid step.

    Aims for ~target_rows rows in the big v-projection matmul so the MXU is
    reasonably full, while keeping batch_tile a divisor of B so every block is
    full-sized (no ragged tiles).
    """
    if B * N <= target_rows:
        return B
    best = 1
    for d in range(1, B + 1):
        if B % d == 0 and d * N <= target_rows and (d % 8 == 0 or d == B):
            best = max(best, d)
    return best


def _qv_attn_kernel(v_ref, q_ref, wv_ref, bv_ref, wq_ref, bq_ref, wl_ref,
                    out_ref, *, batch_tile, num_boxes):
    """One grid step = `batch_tile` batch elements.

    v_ref : (batch_tile*N, v_dim)  flattened visual features for these batches
    q_ref : (batch_tile, q_dim)    ONE question row per batch element
    wv/bv : (v_dim, H), (1, H)
    wq/bq : (q_dim, H), (1, H)
    wl    : (1, H)                 final Linear(H->1) weight as a row
    out   : (batch_tile, N)        lane-dense softmax attention scores
    """
    # --- v projection: one large MXU matmul over all rows of this tile ------
    vh = jnp.dot(v_ref[...], wv_ref[...], preferred_element_type=jnp.float32)
    vh = jnp.maximum(vh + bv_ref[...], 0.0)                   # (bt*N, H) f32

    # --- q projection: once per batch element, NOT once per box -------------
    qh = jnp.dot(q_ref[...], wq_ref[...], preferred_element_type=jnp.float32)
    qh = jnp.maximum(qh + bq_ref[...], 0.0)                   # (bt, H) f32

    # Fold the final Linear(H->1) into the q row:
    #   (qh * vh) @ wl == sum_h vh * (qh * wl)
    qhw = qh * wl_ref[...]                                    # (bt, H)

    # Broadcast the per-batch q row against the per-box v rows (in VMEM) and
    # contract H on the VPU (multiply) + XLU (lane reduction). No MXU needed.
    H = vh.shape[-1]
    vh3 = vh.reshape(batch_tile, num_boxes, H)                # (bt, N, H)
    logit = jnp.sum(vh3 * qhw[:, None, :], axis=-1)           # (bt, N)
    # NOTE: the scalar bias of Linear(H->1) is omitted — softmax over the box
    # axis is invariant to adding a constant per row, so the output is
    # unchanged.

    # --- row-wise softmax over the box (lane) axis ---------------------------
    m = jnp.max(logit, axis=-1, keepdims=True)                # (bt, 1)
    e = jnp.exp(logit - m)                                    # (bt, N)
    s = jnp.sum(e, axis=-1, keepdims=True)                    # (bt, 1)
    attn = e * pl.reciprocal(s, approx=False)                 # exact; approx=True -> EUP, ~1e-3 err

    out_ref[...] = attn.astype(out_ref.dtype)                 # lane-dense (bt, N)


def qv_mult_attention(v_emb, q_emb, params, *, matmul_dtype=jnp.float32):
    """Pallas implementation of QVMultAttention.forward.

    v_emb: (B, N, v_dim) float32
    q_emb: (B, q_dim)    float32
    returns: (B, N) float32 softmax attention scores over the N boxes
    """
    B, N, v_dim = v_emb.shape
    q_dim = q_emb.shape[-1]
    H = params["wq"].shape[1]

    bt = _pick_batch_tile(B, N)
    grid = (B // bt,)

    # Matmul operands may be downcast (bf16 on v6e/v7x); biases / softmax stay f32.
    v_flat = v_emb.reshape(B * N, v_dim).astype(matmul_dtype)
    q_in = q_emb.astype(matmul_dtype)
    wv = params["wv"].astype(matmul_dtype)
    wq = params["wq"].astype(matmul_dtype)
    bv = params["bv"].reshape(1, H).astype(jnp.float32)
    bq = params["bq"].reshape(1, H).astype(jnp.float32)
    wl = params["wl"].reshape(1, H).astype(jnp.float32)
    # params["bl"] (scalar bias of Linear(H->1)) is intentionally unused: it is
    # a per-row constant shift of the logits and cancels inside the softmax.

    kernel = functools.partial(_qv_attn_kernel, batch_tile=bt, num_boxes=N)

    out = pl.pallas_call(
        kernel,
        out_shape=jax.ShapeDtypeStruct((B, N), jnp.float32),
        grid=grid,
        in_specs=[
            pl.BlockSpec((bt * N, v_dim), lambda b: (b, 0)),
            pl.BlockSpec((bt, q_dim), lambda b: (b, 0)),
            # Weights / biases use constant index maps -> DMA'd once, kept
            # resident across all grid steps (no per-step re-fetch).
            pl.BlockSpec((v_dim, H), lambda b: (0, 0)),
            pl.BlockSpec((1, H), lambda b: (0, 0)),
            pl.BlockSpec((q_dim, H), lambda b: (0, 0)),
            pl.BlockSpec((1, H), lambda b: (0, 0)),
            pl.BlockSpec((1, H), lambda b: (0, 0)),
        ],
        out_specs=pl.BlockSpec((bt, N), lambda b: (b, 0)),
        compiler_params=pltpu.CompilerParams(
            # Grid steps handle disjoint batches -> shardable across TCs.
            dimension_semantics=("parallel",),
            # NOTE(v7x): with large v_dim/H, set vmem_limit_bytes explicitly so
            # weights + the row tile fit the 64 MiB VMEM; defaults suffice here.
        ),
    )(v_flat, q_in, wv, bv, wq, bq, wl)

    return out


def _reference(v_emb, q_emb, params):
    """Pure-JAX reference mirroring the PyTorch forward."""
    B, N, _ = v_emb.shape
    q = jnp.broadcast_to(q_emb[:, None, :], (B, N, q_emb.shape[-1]))
    qh = jnp.maximum(q @ params["wq"] + params["bq"], 0.0)
    vh = jnp.maximum(v_emb @ params["wv"] + params["bv"], 0.0)
    logit = (qh * vh) @ params["wl"] + params["bl"]            # (B, N)
    return jax.nn.softmax(logit, axis=1)


def _init_params(key, q_dim, v_dim, num_hid):
    """Deterministic PyTorch-Linear-style init: U(-1/sqrt(fan_in), 1/sqrt(fan_in))."""
    ks = jax.random.split(key, 6)

    def lin(kw, kb, fan_in, fan_out):
        bound = 1.0 / jnp.sqrt(fan_in)
        w = jax.random.uniform(kw, (fan_in, fan_out), jnp.float32, -bound, bound)
        b = jax.random.uniform(kb, (fan_out,), jnp.float32, -bound, bound)
        return w, b

    wq, bq = lin(ks[0], ks[1], q_dim, num_hid)
    wv, bv = lin(ks[2], ks[3], v_dim, num_hid)
    wl, bl = lin(ks[4], ks[5], num_hid, 1)
    return {"wq": wq, "bq": bq, "wv": wv, "bv": bv,
            "wl": wl[:, 0], "bl": bl[0]}


if __name__ == "__main__":
    B, N = 2, 8          # batch, num_boxes
    q_dim, v_dim, num_hid = 32, 32, 32

    key = jax.random.PRNGKey(0)
    k_v, k_q, k_p = jax.random.split(key, 3)

    v_emb = jax.random.normal(k_v, (B, N, v_dim), jnp.float32)
    q_emb = jax.random.normal(k_q, (B, q_dim), jnp.float32)
    params = _init_params(k_p, q_dim, v_dim, num_hid)

    attn = qv_mult_attention(v_emb, q_emb, params)
    attn = jax.block_until_ready(attn)

    ref = _reference(v_emb, q_emb, params)
    assert attn.shape == (B, N)
    assert jnp.allclose(attn, ref, atol=1e-5, rtol=1e-5), "mismatch vs reference"
    assert jnp.allclose(jnp.sum(attn, axis=1), 1.0, atol=1e-5)

    print("KERNEL_OK")
</pallas_src>

<mosaic_0001>
module attributes {stable_mosaic.version = 11 : i64} {
  func.func @_qv_attn_kernel(%arg0: i32, %arg1: memref<16x32xf32, #tpu.memory_space<vmem>>, %arg2: memref<2x32xf32, #tpu.memory_space<vmem>>, %arg3: memref<32x32xf32, #tpu.memory_space<vmem>>, %arg4: memref<1x32xf32, #tpu.memory_space<vmem>>, %arg5: memref<32x32xf32, #tpu.memory_space<vmem>>, %arg6: memref<1x32xf32, #tpu.memory_space<vmem>>, %arg7: memref<1x32xf32, #tpu.memory_space<vmem>>, %arg8: memref<2x8xf32, #tpu.memory_space<vmem>>) attributes {dimension_semantics = [#tpu.dimension_semantics<parallel>], iteration_bounds = array<i64: 1>, scalar_prefetch = 0 : i64, scratch_operands = 0 : i64, tpu.core_type = #tpu.core_type<tc>, window_params = [{transform_indices = @transform_0, window_bounds = array<i64: 16, 32>}, {transform_indices = @transform_1, window_bounds = array<i64: 2, 32>}, {pipeline_mode = #tpu.pipeline_mode<synchronous>, transform_indices = @transform_2, window_bounds = array<i64: 32, 32>}, {pipeline_mode = #tpu.pipeline_mode<synchronous>, transform_indices = @transform_3, window_bounds = array<i64: 1, 32>}, {pipeline_mode = #tpu.pipeline_mode<synchronous>, transform_indices = @transform_4, window_bounds = array<i64: 32, 32>}, {pipeline_mode = #tpu.pipeline_mode<synchronous>, transform_indices = @transform_5, window_bounds = array<i64: 1, 32>}, {pipeline_mode = #tpu.pipeline_mode<synchronous>, transform_indices = @transform_6, window_bounds = array<i64: 1, 32>}, {transform_indices = @transform_7, window_bounds = array<i64: 2, 8>}]} {
    %c0 = arith.constant 0 : index
    %c0_0 = arith.constant 0 : index
    %0 = vector.load %arg1[%c0, %c0_0] : memref<16x32xf32, #tpu.memory_space<vmem>>, vector<16x32xf32>
    %c0_1 = arith.constant 0 : index
    %c0_2 = arith.constant 0 : index
    %1 = vector.load %arg3[%c0_1, %c0_2] : memref<32x32xf32, #tpu.memory_space<vmem>>, vector<32x32xf32>
    %cst = arith.constant dense<0.000000e+00> : vector<16x32xf32>
    %2 = tpu.matmul %0, %1, %cst {dimension_numbers = #tpu.dot_dimension_numbers<[1], [0], [0], [1], [0, 0, 1, 1], [], []>} : vector<16x32xf32>, vector<32x32xf32>, vector<16x32xf32> -> vector<16x32xf32>
    %c0_3 = arith.constant 0 : index
    %c0_4 = arith.constant 0 : index
    %3 = vector.load %arg4[%c0_3, %c0_4] : memref<1x32xf32, #tpu.memory_space<vmem>>, vector<1x32xf32>
    %4 = vector.broadcast %3 : vector<1x32xf32> to vector<16x32xf32>
    %5 = arith.addf %2, %4 : vector<16x32xf32>
    %cst_5 = arith.constant 0.000000e+00 : f32
    %6 = vector.broadcast %cst_5 : f32 to vector<16x32xf32>
    %7 = arith.maximumf %5, %6 : vector<16x32xf32>
    %c0_6 = arith.constant 0 : index
    %c0_7 = arith.constant 0 : index
    %8 = vector.load %arg2[%c0_6, %c0_7] : memref<2x32xf32, #tpu.memory_space<vmem>>, vector<2x32xf32>
    %c0_8 = arith.constant 0 : index
    %c0_9 = arith.constant 0 : index
    %9 = vector.load %arg5[%c0_8, %c0_9] : memref<32x32xf32, #tpu.memory_space<vmem>>, vector<32x32xf32>
    %cst_10 = arith.constant dense<0.000000e+00> : vector<2x32xf32>
    %10 = tpu.matmul %8, %9, %cst_10 {dimension_numbers = #tpu.dot_dimension_numbers<[1], [0], [0], [1], [0, 0, 1, 1], [], []>} : vector<2x32xf32>, vector<32x32xf32>, vector<2x32xf32> -> vector<2x32xf32>
    %c0_11 = arith.constant 0 : index
    %c0_12 = arith.constant 0 : index
    %11 = vector.load %arg6[%c0_11, %c0_12] : memref<1x32xf32, #tpu.memory_space<vmem>>, vector<1x32xf32>
    %12 = vector.broadcast %11 : vector<1x32xf32> to vector<2x32xf32>
    %13 = arith.addf %10, %12 : vector<2x32xf32>
    %cst_13 = arith.constant 0.000000e+00 : f32
    %14 = vector.broadcast %cst_13 : f32 to vector<2x32xf32>
    %15 = arith.maximumf %13, %14 : vector<2x32xf32>
    %c0_14 = arith.constant 0 : index
    %c0_15 = arith.constant 0 : index
    %16 = vector.load %arg7[%c0_14, %c0_15] : memref<1x32xf32, #tpu.memory_space<vmem>>, vector<1x32xf32>
    %17 = vector.broadcast %16 : vector<1x32xf32> to vector<2x32xf32>
    %18 = arith.mulf %15, %17 : vector<2x32xf32>
    %19 = vector.shape_cast %7 : vector<16x32xf32> to vector<2x8x32xf32>
    %20 = vector.shape_cast %18 : vector<2x32xf32> to vector<2x1x32xf32>
    %21 = vector.broadcast %20 : vector<2x1x32xf32> to vector<2x8x32xf32>
    %22 = arith.mulf %19, %21 : vector<2x8x32xf32>
    %cst_16 = arith.constant dense<0.000000e+00> : vector<2x8xf32>
    %23 = vector.multi_reduction <add>, %22, %cst_16 [2] : vector<2x8x32xf32> to vector<2x8xf32>
    %cst_17 = arith.constant dense<0xFF800000> : vector<2xf32>
    %24 = vector.multi_reduction <maximumf>, %23, %cst_17 [1] : vector<2x8xf32> to vector<2xf32>
    %25 = vector.shape_cast %24 : vector<2xf32> to vector<2x1xf32>
    %26 = vector.broadcast %25 : vector<2x1xf32> to vector<2x8xf32>
    %27 = arith.subf %23, %26 : vector<2x8xf32>
    %28 = math.exp %27 : vector<2x8xf32>
    %cst_18 = arith.constant dense<0.000000e+00> : vector<2xf32>
    %29 = vector.multi_reduction <add>, %28, %cst_18 [1] : vector<2x8xf32> to vector<2xf32>
    %30 = vector.shape_cast %29 : vector<2xf32> to vector<2x1xf32>
    %31 = tpu.reciprocal %30 : vector<2x1xf32> -> vector<2x1xf32>
    %32 = vector.broadcast %31 : vector<2x1xf32> to vector<2x8xf32>
    %33 = arith.mulf %28, %32 : vector<2x8xf32>
    %c0_19 = arith.constant 0 : index
    %c0_20 = arith.constant 0 : index
    %34 = vector.load %arg8[%c0_19, %c0_20] : memref<2x8xf32, #tpu.memory_space<vmem>>, vector<2x8xf32>
    tpu.vector_store %arg8[%c0_19, %c0_20], %33 {strides = array<i32>} : memref<2x8xf32, #tpu.memory_space<vmem>>, vector<2x8xf32>,
    return
  }
  func.func @transform_0(%arg0: i32) -> (i32, i32) {
    %c0_i32 = arith.constant 0 : i32
    %c0_i32_0 = arith.constant 0 : i32
    return %arg0, %c0_i32 : i32, i32
  }
  func.func @transform_1(%arg0: i32) -> (i32, i32) {
    %c0_i32 = arith.constant 0 : i32
    %c0_i32_0 = arith.constant 0 : i32
    return %arg0, %c0_i32 : i32, i32
  }
  func.func @transform_2(%arg0: i32) -> (i32, i32) {
    %c0_i32 = arith.constant 0 : i32
    %c0_i32_0 = arith.constant 0 : i32
    %c0_i32_1 = arith.constant 0 : i32
    return %c0_i32, %c0_i32_0 : i32, i32
  }
  func.func @transform_3(%arg0: i32) -> (i32, i32) {
    %c0_i32 = arith.constant 0 : i32
    %c0_i32_0 = arith.constant 0 : i32
    %c0_i32_1 = arith.constant 0 : i32
    return %c0_i32, %c0_i32_0 : i32, i32
  }
  func.func @transform_4(%arg0: i32) -> (i32, i32) {
    %c0_i32 = arith.constant 0 : i32
    %c0_i32_0 = arith.constant 0 : i32
    %c0_i32_1 = arith.constant 0 : i32
    return %c0_i32, %c0_i32_0 : i32, i32
  }
  func.func @transform_5(%arg0: i32) -> (i32, i32) {
    %c0_i32 = arith.constant 0 : i32
    %c0_i32_0 = arith.constant 0 : i32
    %c0_i32_1 = arith.constant 0 : i32
    return %c0_i32, %c0_i32_0 : i32, i32
  }
  func.func @transform_6(%arg0: i32) -> (i32, i32) {
    %c0_i32 = arith.constant 0 : i32
    %c0_i32_0 = arith.constant 0 : i32
    %c0_i32_1 = arith.constant 0 : i32
    return %c0_i32, %c0_i32_0 : i32, i32
  }
  func.func @transform_7(%arg0: i32) -> (i32, i32) {
    %c0_i32 = arith.constant 0 : i32
    %c0_i32_0 = arith.constant 0 : i32
    return %arg0, %c0_i32 : i32, i32
  }
}

</mosaic_0001>

<bundles_post_ra>
// kernel: tpu_custom_call.1
= control target key start
LH: loop header
LB: loop body
LE: loop exit
PB: predicated region body
PF: predicated region fallthrough
CT: control target
= control target key end

     0   :  { %12 = vsyncpa [#allocation3], 0  ;;  %s520_s0 = inlined_call_operand.hbm [shape: f32[16,32], index: 0, kind: input, shape index: {}]   ;;  %s521_s1 = inlined_call_operand.hbm [shape: f32[2,32], index: 1, kind: input, shape index: {}]   ;;  %s522_s2 = inlined_call_operand.hbm [shape: f32[32,32], index: 2, kind: input, shape index: {}]   ;;  %s523_s3 = inlined_call_operand.vmem [shape: f32[1,32], index: 3, kind: input, shape index: {}]   ;;  %s524_s4 = inlined_call_operand.hbm [shape: f32[32,32], index: 4, kind: input, shape index: {}]   ;;  %s525_s5 = inlined_call_operand.vmem [shape: f32[1,32], index: 5, kind: input, shape index: {}]   ;;  %s526_s6 = inlined_call_operand.vmem [shape: f32[1,32], index: 6, kind: input, shape index: {}]   ;;  %s527_s7 = inlined_call_operand.hbm [shape: f32[2,8], index: 7, kind: output, shape index: {}]  }
   0x1   :  { %13 = vsyncpa [#allocation6], 0 }
   0x2   :  { %14 = vsyncpa [#allocation9], 0  ;;  %s34_s26 = sshll.u32 %s521_s1, 4  ;;  %s35_s26 = int_to_ptr.hbm [resolvable:$true] %s34_s26 }
   0x3   :  { %15 = vsyncpa [#allocation4], 0  ;;  %s429_s27 = smov [#allocation5]   ;;  %s20_s8 = sshll.u32 %s520_s0, 4  ;;  %s21_s8 = int_to_ptr.hbm [resolvable:$true] %s20_s8 }
   0x4   :  { %s36_s28 = sshll.u32 %s429_s27, 4  ;;  %s430_s9 = smov [#allocation2]   ;;  %s37_s28 = int_to_ptr.vmem [resolvable:$true] %s36_s28 }
   0x5   :  { %39 = dma.hbm_to_vmem [thread:$0]  %s35_s26, 32, %s37_s28, [#allocation6]  }
   0x6   :  { %s22_s10 = sshll.u32 %s430_s9, 4  ;;  %s431_s11 = smov 128   ;;  %s23_s10 = int_to_ptr.vmem [resolvable:$true] %s22_s10 }
   0x7   :  { %s432_s12 = smov 8   ;;  %s44_s1 = sshll.u32 %s522_s2, 4  ;;  %s45_s1 = int_to_ptr.hbm [resolvable:$true] %s44_s1 }
   0x8   :  { %28 = dma.hbm_to_vmem [thread:$0]  %s21_s8, 256, %s23_s10, [#allocation3], %s431_s11, %s431_s11, %s432_s12  }
   0x9   :  { %s433_s15 = smov [#allocation7]   ;;  %s59_s0 = sshll.u32 %s524_s4, 4  ;;  %s60_s0 = int_to_ptr.hbm [resolvable:$true] %s59_s0 }
   0xa   :  { %s46_s16 = sshll.u32 %s433_s15, 4  ;;  %s434_s19 = smov [#allocation8]   ;;  %s47_s16 = int_to_ptr.vmem [resolvable:$true] %s46_s16 }
   0xb   :  { %52 = dma.hbm_to_vmem [thread:$0]  %s45_s1, 512, %s47_s16, [#allocation6], %s431_s11, %s431_s11, %s432_s12  }
   0xc   :  { %s61_s20 = sshll.u32 %s434_s19, 4  ;;  %s62_s20 = int_to_ptr.vmem [resolvable:$true] %s61_s20 }
   0xd   :  { %67 = dma.hbm_to_vmem [thread:$0]  %s60_s0, 512, %s62_s20, [#allocation9], %s431_s11, %s431_s11, %s432_s12  }
   0xe   :  { %421 = dma.done.wait [#allocation3], 256  }
   0xf   :  { %422 = vsyncadd [#allocation3], 4294967040 }
  0x10   :  { %423 = dma.done.wait [#allocation6], 544  }
  0x11   :  { %424 = vsyncadd [#allocation6], 4294966752 }
  0x12   :  { %425 = dma.done.wait [#allocation9], 512  }
  0x13   :  { %426 = vsyncadd [#allocation9], 4294966784  ;;  %v93_v0 = vld [vmem:[#allocation7 + $0x18] sm:$0xff]  ;;  %v92_v2 = vld [vmem:[#allocation7 + $0x10] sm:$0xff]  ;;  %vm98_vm0 = vcmask 261120   ;;  %v184_v32 = vlaneseq  ;;  %vm188_vm1 = vcmask 1041409  }
  0x14   :  { %v134_v1 = vld [vmem:[#allocation8 + $0x18] sm:$0xff]  ;;  %277 = vmatpush.msra.mxu2 %v93_v0  ;;  %v133_v3 = vld [vmem:[#allocation8 + $0x10] sm:$0xff]  ;;  %117 = vmatpush.msra.mxu0 %v93_v0  ;;  %v91_v4 = vld [vmem:[#allocation7 + $0x8] sm:$0xff]  ;;  %vm191_vm2 = vcmask 58368   ;;  %v435_v39 = vmov 0   ;;  %s262_s26 = sshll.u32 %s527_s7, 4  ;;  %s263_s26 = int_to_ptr.hbm [resolvable:$true] %s262_s26 }
  0x15   :  { %154 = vmatpush.msra.mxu1 %v134_v1  ;;  %v132_v5 = vld [vmem:[#allocation8 + $0x8] sm:$0xff]  ;;  %v90_v6 = vld [vmem:[#allocation7] sm:$0xff]  ;;  %v89_v8 = vld [vmem:[#allocation2 + $0x8] sm:$0xff]  ;;  %v503_v33 = vand.u32 127, %v184_v32  ;;  %290 = vset.pattern.permute.xlu2 %v435_v39 }
  0x16   :  { %278 = vmatpush.msra.mxu2 %v92_v2  ;;  %118 = vmatpush.msra.mxu0 %v92_v2  ;;  %v131_v7 = vld [vmem:[#allocation8] sm:$0xff]  ;;  %v130_v9 = vld [vmem:[#allocation5] sm:$0x3]  ;;  %v88_v10 = vld [vmem:[#allocation2] sm:$0xff] }
  0x17   :  { %155 = vmatpush.msra.mxu1 %v133_v3  ;;  %v292_v11 = vld [vmem:[%s525_s5] ss:$0 sm:$0xff]  ;;  %289 = vset.pattern.permute.xlu1 %v435_v39 }
  0x18   :  { %279 = vmatpush.msra.mxu2 %v91_v4  ;;  %119 = vmatpush.msra.mxu0 %v91_v4  ;;  %v294_v12 = vld [vmem:[%s523_s3] ss:$0 sm:$0xff]  ;;  %s436_s3 = smov [#allocation10]  }
  0x19   :  { %156 = vmatpush.msra.mxu1 %v132_v5  ;;  %v293_v15 = vld [vmem:[%s526_s6] ss:$0 sm:$0xff]  ;;  %291 = vset.pattern.permute.xlu0 %v435_v39  ;;  %s260_s5 = sshll.u32 %s436_s3, 4  ;;  %s261_s5 = int_to_ptr.vmem [resolvable:$true] %s260_s5 }
  0x1a   :  { %280 = vmatpush.msra.mxu2 %v90_v6  ;;  %120 = vmatpush.msra.mxu0 %v90_v6 }
  0x1b   :  { %157 = vmatpush.msra.mxu1 %v131_v7  ;;  %275 = vmatmul.msk.f32.vlgmr.msra.gmra.mxu2 %vm98_vm0, %v89_v8 }
  0x1c   :  { %276 = vmatmul.msk.f32.vlgmr.msra.gmra.mxu1 %vm98_vm0, %v130_v9  ;;  %274 = vmatmul.msk.f32.vlgmr.msra.gmra.mxu0 %vm98_vm0, %v88_v10 }
  0x99   :  { %v159_v13 = vpop.f32.mrf.mxu1  ;;  %v122_v16 = vpop.f32.mrf.mxu0 }
  0x9a   :  { %v160_v14 = vadd.f32 %v292_v11, %v159_v13  ;;  %v123_v18 = vadd.f32 %v294_v12, %v122_v16 }
  0x9c   :  { %v162_v17 = vmax.f32 %v160_v14, 0.0  ;;  %v128_v20 = vmax.f32 %v123_v18, 0.0 }
  0x9e   :  { %v167_v19 = vmul.f32 %v293_v15, %v162_v17  ;;  %v125_v21 = vpop.f32.mrf.mxu2 }
  0x9f   :  { %v126_v22 = vadd.f32 %v294_v12, %v125_v21 }
  0xa0   :  { %v170_v23 = vperm.slane %v167_v19, 0  ;;  %v169_v24 = vrot.slane %v167_v19, 1 }
  0xa1   :  { %v129_v26 = vmax.f32 %v126_v22, 0.0 }
  0xa2   :  { %v174_v25 = vmul.f32 %v170_v23, %v128_v20  ;;  %v171_v28 = vperm.slane %v169_v24, 0 }
  0xa4   :  { %v176_v27 = vsel %vm98_vm0, %v174_v25, 0.0  ;;  %v175_v29 = vmul.f32 %v171_v28, %v129_v26 }
  0xa5   :  { %177 = vadd.xlane.f32.xlu0 %v176_v27 }
  0xa6   :  { %v179_v30 = vsel %vm98_vm0, %v175_v29, 0.0 }
  0xad   :  { %180 = vadd.xlane.f32.xlu0 %v179_v30 }
 0x118   :  { %v178_v31 = vpop.xlane.xlu0 %177 }
 0x119   :  { %v186_v35 = vperm.slane %v178_v31, %v503_v33 }
 0x120   :  { %v181_v34 = vpop.xlane.xlu0 %180 }
 0x121   :  { %v187_v36 = vperm.slane %v181_v34, %v503_v33 }
 0x123   :  { %v189_v37 = vsel %vm188_vm1, %v187_v36, %v186_v35 }
 0x124   :  { %v192_v38 = vsel %vm191_vm2, %v189_v37, -inf }
 0x125   :  { %193 = vmax.xlane.f32.xlu1 %v192_v38 }
 0x198   :  { %v194_v40 = vpop.xlane.xlu1 %193 }
 0x199   :  { %v196_v41 = vperm.slane %v194_v40, 0  ;;  %v197_v42 = vperm.slane %v194_v40, 1 }
 0x19b   :  { %v200_v43 = vsub.f32 %v178_v31, %v196_v41  ;;  %v201_v44 = vsub.f32 %v181_v34, %v197_v42 }
 0x19d   :  { %v202_v45 = vmul.f32 1.442695, %v200_v43  ;;  %v204_v46 = vmul.f32 1.442695, %v201_v44 }
 0x19f   :  { %295 = vpow2.f32 %v202_v45 }
 0x1a0   :  { %297 = vpow2.f32 %v204_v46 }
 0x1a5   :  { %v296_v47 = vpop.eup %295 }
 0x1a6   :  { %v298_v48 = vpop.eup %297  ;;  %209 = vperm.xlu1 %289, %v296_v47  }
 0x1a7   :  { %212 = vperm.xlu2 %290, %v298_v48  }
 0x201   :  { %v213_v49 = vpop.permute.xlu2 %212 }
 0x202   :  { %v215_v51 = vperm.slane %v213_v49, %v503_v33 }
 0x218   :  { %v210_v50 = vpop.permute.xlu1 %209 }
 0x219   :  { %v214_v52 = vperm.slane %v210_v50, %v503_v33 }
 0x21b   :  { %v216_v53 = vsel %vm188_vm1, %v215_v51, %v214_v52 }
 0x21c   :  { %v218_v54 = vsel %vm191_vm2, %v216_v53, 0.0 }
 0x21d   :  { %219 = vadd.xlane.f32.xlu2 %v218_v54 }
 0x290   :  { %v220_v55 = vpop.xlane.xlu2 %219 }
 0x291   :  { %299 = vrcp.f32 %v220_v55  ;;  %v232_v59 = vand.u32 2147483648, %v220_v55  ;;  %v230_v61 = vand.u32 2147483647, %v220_v55  ;;  %vm226_vm4 = vweird.f32 %v220_v55 }
 0x293   :  { %v233_v63 = vor.u32 1.1754944e-38, %v232_v59  ;;  %vm231_vm6 = vcmp.eq.f32.partialorder %v230_v61, 8.507059e+37 }
 0x297   :  { %v300_v56 = vpop.eup %299 }
 0x298   :  { %v222_v57 = vmul.f32 %v300_v56, %v220_v55  ;;  %vm227_vm3 = vweird.f32 %v300_v56 }
 0x299   :  { %vm228_vm5 = vmor %vm226_vm4, %vm227_vm3 }
 0x29a   :  { %v223_v58 = vsub.f32 1.0, %v222_v57 }
 0x29c   :  { %v224_v60 = vmul.f32 %v300_v56, %v223_v58 }
 0x29e   :  { %v225_v62 = vadd.f32 %v300_v56, %v224_v60 }
 0x2a0   :  { %v229_v0 = vsel %vm228_vm5, %v300_v56, %v225_v62 }
 0x2a1   :  { %v234_v1 = vsel %vm231_vm6, %v233_v63, %v229_v0 }
 0x2a2   :  { %v237_v2 = vperm.slane %v234_v1, 1  ;;  %v236_v3 = vperm.slane %v234_v1, 0 }
 0x2a4   :  { %v241_v4 = vmul.f32 %v298_v48, %v237_v2  ;;  %v240_v5 = vmul.f32 %v296_v47, %v236_v3 }
 0x2a6   :  { %248 = vperm.xlu1 %289, %v241_v4   ;;  %245 = vperm.xlu0 %291, %v240_v5  }
 0x318   :  { %v249_v6 = vpop.permute.xlu1 %248  ;;  %v246_v7 = vpop.permute.xlu0 %245 }
 0x319   :  { %v251_v8 = vperm.slane %v249_v6, %v503_v33  ;;  %v250_v9 = vperm.slane %v246_v7, %v503_v33 }
 0x31b   :  { %v252_v10 = vsel %vm188_vm1, %v251_v8, %v250_v9 }
 0x31c   :  { %254 = vst.msk [vmem:[#allocation10] sm:$0x3] %vm191_vm2, %v252_v10 }
 0x31d   :  { %265 = dma.vmem_to_hbm [thread:$0]  %s261_s5, 32, %s263_s26, [#allocation4]  }
 0x31e   :  { %427 = dma.done.wait [#allocation4], 32  }
 0x31f   :  { %428 = vsyncadd [#allocation4], 4294967264 }
 0x320   :  { %270 = vsyncpa [#allocation3], 1 }
 0x321   :  { %271 = vsyncpa [#allocation6], 1 }
 0x322   :  { %272 = vsyncpa [#allocation9], 1 }
 0x323   :  { %273 = vsyncpa [#allocation4], 1 }

</bundles_post_ra>
